<compile_context>
chip_gen: v7x
topology: tpu7x:2x2x1
jax: 0.10.0
libtpu: 0.0.40
codegen_flags: <defaults>
</compile_context>

<pallas_src>
import functools

import numpy as np
import jax
import jax.numpy as jnp
from jax.experimental import pallas as pl
from jax.experimental.pallas import tpu as pltpu

C_OUT = 4
K = 3  # conv kernel size
_VMEM_LIMIT = 32 * 1024 * 1024          # safe on v5e/v6e/v7x (v7x: 64 MiB physical/TC)
_STEP_BUDGET = 8 * 1024 * 1024          # target in+out bytes per grid step
_CHUNK_BYTES = 32 * 1024                # ~8 vregs per live (chunk, lanes) temporary


def _blocking(n, in_row_bytes, out_row_bytes):
    """Pick (nb, chunk): batch rows per grid step and per in-kernel chunk."""
    row_bytes = in_row_bytes + out_row_bytes
    chunk = _CHUNK_BYTES // max(1, in_row_bytes)
    chunk = max(8, min(512, chunk - chunk % 8))
    nb = min(n, max(8, _STEP_BUDGET // max(1, row_bytes)))
    if nb < n:
        nb -= nb % 8                      # BlockSpec sublane rule (mult of 8 or full dim)
    elif n * row_bytes >= 2 * 1024 * 1024:
        # Enough data to feed both v7x TensorCores with >= ~1 MiB each.
        half = (n + 1) // 2
        half -= half % 8
        if half >= 8:
            nb = half
    return max(1, nb), max(1, min(chunk, nb))


def _foreach_row_chunk(nb, chunk, body):
    """Run body(r0, rows) over the block's nb batch rows in `chunk`-row pieces.

    Bounds intermediate live ranges (keeps the tap/accumulator working set near
    the vreg file instead of whole-block VMEM temporaries)."""
    steps, rem = divmod(nb, chunk)
    if steps == 1 and rem == 0:           # single chunk: no loop machinery at all
        body(0, chunk)
        return
    if steps > 0:
        @pl.loop(0, steps)
        def _(s):
            body(pl.multiple_of(s * chunk, chunk), chunk)
    if rem:
        body(steps * chunk, rem)


# ----------------------------- conv kernel ----------------------------------
def _conv_kernel(x_ref, w_ref, b_ref, mask_ref, o_ref, *, H, W, chunk):
    # x_ref    : VMEM (NB, HW)        batch on sublanes, flattened image on lanes
    # w_ref    : SMEM (C_OUT*K*K,)    OIHW-flattened weights (C_in == 1)
    # b_ref    : SMEM (C_OUT,)        bias
    # mask_ref : VMEM (K*K, HW)       1.0 where the tap reads a real pixel (zero-pad mask)
    # o_ref    : VMEM (NB, C_OUT*HW)  per-channel images concatenated on lanes
    HW = H * W
    nb = x_ref.shape[0]
    center = (K * K) // 2

    def rows_body(r0, rows):
        xf = x_ref[pl.ds(r0, rows), :]                               # (rows, HW)
        # Centre tap + bias initialise the 4 per-channel accumulators.
        acc = [xf * w_ref[co * K * K + center] + b_ref[co] for co in range(C_OUT)]
        # Remaining 8 taps: build each shifted+masked plane once, FMA into all accs.
        for ki in range(K):
            for kj in range(K):
                di, dj = ki - 1, kj - 1
                if di == 0 and dj == 0:
                    continue
                t = ki * K + kj
                off = di * W + dj                                    # flat tap offset
                plane = pltpu.roll(xf, (-off) % HW, axis=1)          # XLU lane rotation
                plane = plane * mask_ref[pl.ds(t, 1), :]             # (1,HW) broadcast
                for co in range(C_OUT):
                    acc[co] = acc[co] + w_ref[co * K * K + t] * plane
        for co in range(C_OUT):
            # co*HW is a multiple of 128 for lane-aligned HW -> unmasked dense store.
            o_ref[pl.ds(r0, rows), pl.ds(co * HW, HW)] = acc[co].astype(o_ref.dtype)

    _foreach_row_chunk(nb, chunk, rows_body)


@jax.jit
def conv2d_pallas(x, w, b):
    """Conv2d(1, 4, kernel_size=3, padding=1), NCHW, f32."""
    N, Cin, H, W = x.shape
    assert Cin == 1
    HW = H * W
    xf = x.reshape(N, HW).astype(jnp.float32)            # contiguous -> free reshape
    w_flat = w.reshape(-1).astype(jnp.float32)            # (C_OUT*K*K,)
    b_flat = b.reshape(-1).astype(jnp.float32)            # (C_OUT,)

    # Per-tap validity masks for the implicit zero padding (built at trace time,
    # flattened to (K*K, HW), resident across grid steps via constant index_map).
    col = np.arange(HW, dtype=np.int64) % W
    row = np.arange(HW, dtype=np.int64) // W
    masks = np.empty((K * K, HW), dtype=np.float32)
    for ki in range(K):
        for kj in range(K):
            di, dj = ki - 1, kj - 1
            valid = ((row + di >= 0) & (row + di < H) &
                     (col + dj >= 0) & (col + dj < W))
            masks[ki * K + kj] = valid.astype(np.float32)
    masks = jnp.asarray(masks)

    nb, chunk = _blocking(N, HW * 4, C_OUT * HW * 4)
    grid = (pl.cdiv(N, nb),)

    out = pl.pallas_call(
        functools.partial(_conv_kernel, H=H, W=W, chunk=chunk),
        out_shape=jax.ShapeDtypeStruct((N, C_OUT * HW), jnp.float32),
        grid=grid,
        in_specs=[
            pl.BlockSpec((nb, HW), lambda n: (n, 0)),
            pl.BlockSpec(memory_space=pltpu.MemorySpace.SMEM),
            pl.BlockSpec(memory_space=pltpu.MemorySpace.SMEM),
            pl.BlockSpec((K * K, HW), lambda n: (0, 0)),   # resident across steps
        ],
        out_specs=pl.BlockSpec((nb, C_OUT * HW), lambda n: (n, 0)),
        compiler_params=pltpu.CompilerParams(
            dimension_semantics=("parallel",),
            vmem_limit_bytes=_VMEM_LIMIT),
    )(xf, w_flat, b_flat, masks)
    return out.reshape(N, C_OUT, H, W)                    # contiguous -> free reshape


# ----------------------------- pool kernel ----------------------------------
def _pool_kernel(x_ref, o_ref, *, C, H, W, chunk):
    # x_ref : VMEM (NB, C*HW)      batch on sublanes, all channel images on lanes
    # o_ref : VMEM (NB, C*Ho*Wo)   cropped output, written in-kernel (no XLA slice)
    HW = H * W
    L = C * HW
    Ho, Wo = H - 1, W - 1
    nb = x_ref.shape[0]

    def rows_body(r0, rows):
        xf = x_ref[pl.ds(r0, rows), :]                               # (rows, C*HW)
        # 2x2 / stride-1 max via XLU lane rolls; wrap artefacts (incl. channel-seam
        # crossings) land only in the last row/col of each image, which we never store.
        right = pltpu.roll(xf, L - 1, axis=1)                        # x[h,   w+1]
        down = pltpu.roll(xf, L - W, axis=1)                         # x[h+1, w  ]
        diag = pltpu.roll(xf, L - W - 1, axis=1)                     # x[h+1, w+1]
        pooled = jnp.maximum(jnp.maximum(xf, right), jnp.maximum(down, diag))
        # In-kernel crop: one masked row-store of Wo lanes per (channel, output row).
        for c in range(C):
            for h in range(Ho):
                src = pooled[:, c * HW + h * W: c * HW + h * W + Wo]
                o_ref[pl.ds(r0, rows), pl.ds(c * Ho * Wo + h * Wo, Wo)] = src

    _foreach_row_chunk(nb, chunk, rows_body)


@jax.jit
def maxpool2d_pallas(x):
    """MaxPool2d(kernel_size=2, stride=1), NCHW."""
    N, C, H, W = x.shape
    HW = H * W
    Ho, Wo = H - 1, W - 1
    xf = x.reshape(N, C * HW)                              # contiguous -> free reshape
    itemsize = x.dtype.itemsize
    nb, chunk = _blocking(N, C * HW * itemsize, C * Ho * Wo * itemsize)
    grid = (pl.cdiv(N, nb),)

    out = pl.pallas_call(
        functools.partial(_pool_kernel, C=C, H=H, W=W, chunk=chunk),
        out_shape=jax.ShapeDtypeStruct((N, C * Ho * Wo), x.dtype),
        grid=grid,
        in_specs=[pl.BlockSpec((nb, C * HW), lambda n: (n, 0))],
        out_specs=pl.BlockSpec((nb, C * Ho * Wo), lambda n: (n, 0)),
        compiler_params=pltpu.CompilerParams(
            dimension_semantics=("parallel",),
            vmem_limit_bytes=_VMEM_LIMIT),
    )(xf)
    return out.reshape(N, C, Ho, Wo)                       # contiguous -> free reshape


# ----------------------------- module wrapper --------------------------------
class MyModulePallas:
    """JAX/Pallas port of MyModule: forward(x, choice) dispatches conv or pool."""

    def __init__(self, key):
        kw, kb, k1, k2 = jax.random.split(key, 4)
        fan_in = 1 * K * K
        bound = 1.0 / (fan_in ** 0.5)
        self.conv_w = jax.random.uniform(kw, (C_OUT, 1, K, K), jnp.float32, -bound, bound)
        self.conv_b = jax.random.uniform(kb, (C_OUT,), jnp.float32, -bound, bound)
        # Parameters kept for parity with the PyTorch module; never used in forward().
        self.param1 = jax.random.normal(k1, (1, 2), jnp.float32)
        self.param2 = jax.random.normal(k2, (2, 2), jnp.float32)
        # act (ReLU / PReLU) is never applied in forward() -> not lowered.

    def __call__(self, x, choice):
        if choice == "conv":
            return conv2d_pallas(x, self.conv_w, self.conv_b)
        elif choice == "pool":
            return maxpool2d_pallas(x)
        else:
            raise KeyError(choice)


# ----------------------------- reference + main -------------------------------
def _conv_ref(x, w, b):
    out = jax.lax.conv_general_dilated(
        x, w, window_strides=(1, 1), padding=((1, 1), (1, 1)),
        dimension_numbers=("NCHW", "OIHW", "NCHW"))
    return out + b[None, :, None, None]


def _pool_ref(x):
    return jax.lax.reduce_window(
        x, -jnp.inf, jax.lax.max,
        window_dimensions=(1, 1, 2, 2), window_strides=(1, 1, 1, 1),
        padding="VALID")


if __name__ == "__main__":
    key = jax.random.PRNGKey(0)
    k_mod, k_x = jax.random.split(key)
    mod = MyModulePallas(k_mod)

    # Small deterministic input consistent with Conv2d(1, 4, 3, padding=1): N=2, C=1, 16x16.
    x = jax.random.normal(k_x, (2, 1, 16, 16), jnp.float32)

    y_conv = mod(x, "conv")
    y_pool = mod(x, "pool")
    jax.block_until_ready((y_conv, y_pool))

    ref_conv = _conv_ref(x, mod.conv_w, mod.conv_b)
    ref_pool = _pool_ref(x)
    assert y_conv.shape == (2, 4, 16, 16)
    assert y_pool.shape == (2, 1, 15, 15)
    assert jnp.allclose(y_conv, ref_conv, atol=1e-5, rtol=1e-5)
    assert jnp.allclose(y_pool, ref_pool, atol=1e-6, rtol=1e-6)

    print("KERNEL_OK")
</pallas_src>

<mosaic_0001>
module attributes {stable_mosaic.version = 11 : i64} {
  func.func @_conv_kernel(%arg0: i32, %arg1: memref<2x256xf32, #tpu.memory_space<vmem>>, %arg2: memref<36xf32, #tpu.memory_space<smem>>, %arg3: memref<4xf32, #tpu.memory_space<smem>>, %arg4: memref<9x256xf32, #tpu.memory_space<vmem>>, %arg5: memref<2x1024xf32, #tpu.memory_space<vmem>>) attributes {dimension_semantics = [#tpu.dimension_semantics<parallel>], iteration_bounds = array<i64: 1>, scalar_prefetch = 0 : i64, scratch_operands = 0 : i64, tpu.core_type = #tpu.core_type<tc>, window_params = [{transform_indices = @transform_0, window_bounds = array<i64: 2, 256>}, {transform_indices = @transform_1, window_bounds = array<i64: 36>}, {transform_indices = @transform_2, window_bounds = array<i64: 4>}, {pipeline_mode = #tpu.pipeline_mode<synchronous>, transform_indices = @transform_3, window_bounds = array<i64: 9, 256>}, {transform_indices = @transform_4, window_bounds = array<i64: 2, 1024>}]} {
    %c0 = arith.constant 0 : index
    %c0_0 = arith.constant 0 : index
    %0 = vector.load %arg1[%c0, %c0_0] : memref<2x256xf32, #tpu.memory_space<vmem>>, vector<2x256xf32>
    %c4 = arith.constant 4 : index
    %1 = memref.load %arg2[%c4] : memref<36xf32, #tpu.memory_space<smem>>
    %2 = vector.broadcast %1 : f32 to vector<2x256xf32>
    %3 = arith.mulf %0, %2 : vector<2x256xf32>
    %c0_1 = arith.constant 0 : index
    %4 = memref.load %arg3[%c0_1] : memref<4xf32, #tpu.memory_space<smem>>
    %5 = vector.broadcast %4 : f32 to vector<2x256xf32>
    %6 = arith.addf %3, %5 : vector<2x256xf32>
    %c13 = arith.constant 13 : index
    %7 = memref.load %arg2[%c13] : memref<36xf32, #tpu.memory_space<smem>>
    %8 = vector.broadcast %7 : f32 to vector<2x256xf32>
    %9 = arith.mulf %0, %8 : vector<2x256xf32>
    %c1 = arith.constant 1 : index
    %10 = memref.load %arg3[%c1] : memref<4xf32, #tpu.memory_space<smem>>
    %11 = vector.broadcast %10 : f32 to vector<2x256xf32>
    %12 = arith.addf %9, %11 : vector<2x256xf32>
    %c22 = arith.constant 22 : index
    %13 = memref.load %arg2[%c22] : memref<36xf32, #tpu.memory_space<smem>>
    %14 = vector.broadcast %13 : f32 to vector<2x256xf32>
    %15 = arith.mulf %0, %14 : vector<2x256xf32>
    %c2 = arith.constant 2 : index
    %16 = memref.load %arg3[%c2] : memref<4xf32, #tpu.memory_space<smem>>
    %17 = vector.broadcast %16 : f32 to vector<2x256xf32>
    %18 = arith.addf %15, %17 : vector<2x256xf32>
    %c31 = arith.constant 31 : index
    %19 = memref.load %arg2[%c31] : memref<36xf32, #tpu.memory_space<smem>>
    %20 = vector.broadcast %19 : f32 to vector<2x256xf32>
    %21 = arith.mulf %0, %20 : vector<2x256xf32>
    %c3 = arith.constant 3 : index
    %22 = memref.load %arg3[%c3] : memref<4xf32, #tpu.memory_space<smem>>
    %23 = vector.broadcast %22 : f32 to vector<2x256xf32>
    %24 = arith.addf %21, %23 : vector<2x256xf32>
    %c17_i32 = arith.constant 17 : i32
    %25 = tpu.dynamic_rotate %0 by %c17_i32 dim 1 : vector<2x256xf32>, i32 -> vector<2x256xf32>
    %c0_2 = arith.constant 0 : index
    %c0_3 = arith.constant 0 : index
    %26 = vector.load %arg4[%c0_2, %c0_3] : memref<9x256xf32, #tpu.memory_space<vmem>>, vector<1x256xf32>
    %27 = vector.broadcast %26 : vector<1x256xf32> to vector<2x256xf32>
    %28 = arith.mulf %25, %27 : vector<2x256xf32>
    %c0_4 = arith.constant 0 : index
    %29 = memref.load %arg2[%c0_4] : memref<36xf32, #tpu.memory_space<smem>>
    %30 = vector.broadcast %29 : f32 to vector<2x256xf32>
    %31 = arith.mulf %30, %28 : vector<2x256xf32>
    %32 = arith.addf %6, %31 : vector<2x256xf32>
    %c9 = arith.constant 9 : index
    %33 = memref.load %arg2[%c9] : memref<36xf32, #tpu.memory_space<smem>>
    %34 = vector.broadcast %33 : f32 to vector<2x256xf32>
    %35 = arith.mulf %34, %28 : vector<2x256xf32>
    %36 = arith.addf %12, %35 : vector<2x256xf32>
    %c18 = arith.constant 18 : index
    %37 = memref.load %arg2[%c18] : memref<36xf32, #tpu.memory_space<smem>>
    %38 = vector.broadcast %37 : f32 to vector<2x256xf32>
    %39 = arith.mulf %38, %28 : vector<2x256xf32>
    %40 = arith.addf %18, %39 : vector<2x256xf32>
    %c27 = arith.constant 27 : index
    %41 = memref.load %arg2[%c27] : memref<36xf32, #tpu.memory_space<smem>>
    %42 = vector.broadcast %41 : f32 to vector<2x256xf32>
    %43 = arith.mulf %42, %28 : vector<2x256xf32>
    %44 = arith.addf %24, %43 : vector<2x256xf32>
    %c16_i32 = arith.constant 16 : i32
    %45 = tpu.dynamic_rotate %0 by %c16_i32 dim 1 : vector<2x256xf32>, i32 -> vector<2x256xf32>
    %c1_5 = arith.constant 1 : index
    %c0_6 = arith.constant 0 : index
    %46 = vector.load %arg4[%c1_5, %c0_6] : memref<9x256xf32, #tpu.memory_space<vmem>>, vector<1x256xf32>
    %47 = vector.broadcast %46 : vector<1x256xf32> to vector<2x256xf32>
    %48 = arith.mulf %45, %47 : vector<2x256xf32>
    %c1_7 = arith.constant 1 : index
    %49 = memref.load %arg2[%c1_7] : memref<36xf32, #tpu.memory_space<smem>>
    %50 = vector.broadcast %49 : f32 to vector<2x256xf32>
    %51 = arith.mulf %50, %48 : vector<2x256xf32>
    %52 = arith.addf %32, %51 : vector<2x256xf32>
    %c10 = arith.constant 10 : index
    %53 = memref.load %arg2[%c10] : memref<36xf32, #tpu.memory_space<smem>>
    %54 = vector.broadcast %53 : f32 to vector<2x256xf32>
    %55 = arith.mulf %54, %48 : vector<2x256xf32>
    %56 = arith.addf %36, %55 : vector<2x256xf32>
    %c19 = arith.constant 19 : index
    %57 = memref.load %arg2[%c19] : memref<36xf32, #tpu.memory_space<smem>>
    %58 = vector.broadcast %57 : f32 to vector<2x256xf32>
    %59 = arith.mulf %58, %48 : vector<2x256xf32>
    %60 = arith.addf %40, %59 : vector<2x256xf32>
    %c28 = arith.constant 28 : index
    %61 = memref.load %arg2[%c28] : memref<36xf32, #tpu.memory_space<smem>>
    %62 = vector.broadcast %61 : f32 to vector<2x256xf32>
    %63 = arith.mulf %62, %48 : vector<2x256xf32>
    %64 = arith.addf %44, %63 : vector<2x256xf32>
    %c15_i32 = arith.constant 15 : i32
    %65 = tpu.dynamic_rotate %0 by %c15_i32 dim 1 : vector<2x256xf32>, i32 -> vector<2x256xf32>
    %c2_8 = arith.constant 2 : index
    %c0_9 = arith.constant 0 : index
    %66 = vector.load %arg4[%c2_8, %c0_9] : memref<9x256xf32, #tpu.memory_space<vmem>>, vector<1x256xf32>
    %67 = vector.broadcast %66 : vector<1x256xf32> to vector<2x256xf32>
    %68 = arith.mulf %65, %67 : vector<2x256xf32>
    %c2_10 = arith.constant 2 : index
    %69 = memref.load %arg2[%c2_10] : memref<36xf32, #tpu.memory_space<smem>>
    %70 = vector.broadcast %69 : f32 to vector<2x256xf32>
    %71 = arith.mulf %70, %68 : vector<2x256xf32>
    %72 = arith.addf %52, %71 : vector<2x256xf32>
    %c11 = arith.constant 11 : index
    %73 = memref.load %arg2[%c11] : memref<36xf32, #tpu.memory_space<smem>>
    %74 = vector.broadcast %73 : f32 to vector<2x256xf32>
    %75 = arith.mulf %74, %68 : vector<2x256xf32>
    %76 = arith.addf %56, %75 : vector<2x256xf32>
    %c20 = arith.constant 20 : index
    %77 = memref.load %arg2[%c20] : memref<36xf32, #tpu.memory_space<smem>>
    %78 = vector.broadcast %77 : f32 to vector<2x256xf32>
    %79 = arith.mulf %78, %68 : vector<2x256xf32>
    %80 = arith.addf %60, %79 : vector<2x256xf32>
    %c29 = arith.constant 29 : index
    %81 = memref.load %arg2[%c29] : memref<36xf32, #tpu.memory_space<smem>>
    %82 = vector.broadcast %81 : f32 to vector<2x256xf32>
    %83 = arith.mulf %82, %68 : vector<2x256xf32>
    %84 = arith.addf %64, %83 : vector<2x256xf32>
    %c1_i32 = arith.constant 1 : i32
    %85 = tpu.dynamic_rotate %0 by %c1_i32 dim 1 : vector<2x256xf32>, i32 -> vector<2x256xf32>
    %c3_11 = arith.constant 3 : index
    %c0_12 = arith.constant 0 : index
    %86 = vector.load %arg4[%c3_11, %c0_12] : memref<9x256xf32, #tpu.memory_space<vmem>>, vector<1x256xf32>
    %87 = vector.broadcast %86 : vector<1x256xf32> to vector<2x256xf32>
    %88 = arith.mulf %85, %87 : vector<2x256xf32>
    %c3_13 = arith.constant 3 : index
    %89 = memref.load %arg2[%c3_13] : memref<36xf32, #tpu.memory_space<smem>>
    %90 = vector.broadcast %89 : f32 to vector<2x256xf32>
    %91 = arith.mulf %90, %88 : vector<2x256xf32>
    %92 = arith.addf %72, %91 : vector<2x256xf32>
    %c12 = arith.constant 12 : index
    %93 = memref.load %arg2[%c12] : memref<36xf32, #tpu.memory_space<smem>>
    %94 = vector.broadcast %93 : f32 to vector<2x256xf32>
    %95 = arith.mulf %94, %88 : vector<2x256xf32>
    %96 = arith.addf %76, %95 : vector<2x256xf32>
    %c21 = arith.constant 21 : index
    %97 = memref.load %arg2[%c21] : memref<36xf32, #tpu.memory_space<smem>>
    %98 = vector.broadcast %97 : f32 to vector<2x256xf32>
    %99 = arith.mulf %98, %88 : vector<2x256xf32>
    %100 = arith.addf %80, %99 : vector<2x256xf32>
    %c30 = arith.constant 30 : index
    %101 = memref.load %arg2[%c30] : memref<36xf32, #tpu.memory_space<smem>>
    %102 = vector.broadcast %101 : f32 to vector<2x256xf32>
    %103 = arith.mulf %102, %88 : vector<2x256xf32>
    %104 = arith.addf %84, %103 : vector<2x256xf32>
    %c255_i32 = arith.constant 255 : i32
    %105 = tpu.dynamic_rotate %0 by %c255_i32 dim 1 : vector<2x256xf32>, i32 -> vector<2x256xf32>
    %c5 = arith.constant 5 : index
    %c0_14 = arith.constant 0 : index
    %106 = vector.load %arg4[%c5, %c0_14] : memref<9x256xf32, #tpu.memory_space<vmem>>, vector<1x256xf32>
    %107 = vector.broadcast %106 : vector<1x256xf32> to vector<2x256xf32>
    %108 = arith.mulf %105, %107 : vector<2x256xf32>
    %c5_15 = arith.constant 5 : index
    %109 = memref.load %arg2[%c5_15] : memref<36xf32, #tpu.memory_space<smem>>
    %110 = vector.broadcast %109 : f32 to vector<2x256xf32>
    %111 = arith.mulf %110, %108 : vector<2x256xf32>
    %112 = arith.addf %92, %111 : vector<2x256xf32>
    %c14 = arith.constant 14 : index
    %113 = memref.load %arg2[%c14] : memref<36xf32, #tpu.memory_space<smem>>
    %114 = vector.broadcast %113 : f32 to vector<2x256xf32>
    %115 = arith.mulf %114, %108 : vector<2x256xf32>
    %116 = arith.addf %96, %115 : vector<2x256xf32>
    %c23 = arith.constant 23 : index
    %117 = memref.load %arg2[%c23] : memref<36xf32, #tpu.memory_space<smem>>
    %118 = vector.broadcast %117 : f32 to vector<2x256xf32>
    %119 = arith.mulf %118, %108 : vector<2x256xf32>
    %120 = arith.addf %100, %119 : vector<2x256xf32>
    %c32 = arith.constant 32 : index
    %121 = memref.load %arg2[%c32] : memref<36xf32, #tpu.memory_space<smem>>
    %122 = vector.broadcast %121 : f32 to vector<2x256xf32>
    %123 = arith.mulf %122, %108 : vector<2x256xf32>
    %124 = arith.addf %104, %123 : vector<2x256xf32>
    %c241_i32 = arith.constant 241 : i32
    %125 = tpu.dynamic_rotate %0 by %c241_i32 dim 1 : vector<2x256xf32>, i32 -> vector<2x256xf32>
    %c6 = arith.constant 6 : index
    %c0_16 = arith.constant 0 : index
    %126 = vector.load %arg4[%c6, %c0_16] : memref<9x256xf32, #tpu.memory_space<vmem>>, vector<1x256xf32>
    %127 = vector.broadcast %126 : vector<1x256xf32> to vector<2x256xf32>
    %128 = arith.mulf %125, %127 : vector<2x256xf32>
    %c6_17 = arith.constant 6 : index
    %129 = memref.load %arg2[%c6_17] : memref<36xf32, #tpu.memory_space<smem>>
    %130 = vector.broadcast %129 : f32 to vector<2x256xf32>
    %131 = arith.mulf %130, %128 : vector<2x256xf32>
    %132 = arith.addf %112, %131 : vector<2x256xf32>
    %c15 = arith.constant 15 : index
    %133 = memref.load %arg2[%c15] : memref<36xf32, #tpu.memory_space<smem>>
    %134 = vector.broadcast %133 : f32 to vector<2x256xf32>
    %135 = arith.mulf %134, %128 : vector<2x256xf32>
    %136 = arith.addf %116, %135 : vector<2x256xf32>
    %c24 = arith.constant 24 : index
    %137 = memref.load %arg2[%c24] : memref<36xf32, #tpu.memory_space<smem>>
    %138 = vector.broadcast %137 : f32 to vector<2x256xf32>
    %139 = arith.mulf %138, %128 : vector<2x256xf32>
    %140 = arith.addf %120, %139 : vector<2x256xf32>
    %c33 = arith.constant 33 : index
    %141 = memref.load %arg2[%c33] : memref<36xf32, #tpu.memory_space<smem>>
    %142 = vector.broadcast %141 : f32 to vector<2x256xf32>
    %143 = arith.mulf %142, %128 : vector<2x256xf32>
    %144 = arith.addf %124, %143 : vector<2x256xf32>
    %c240_i32 = arith.constant 240 : i32
    %145 = tpu.dynamic_rotate %0 by %c240_i32 dim 1 : vector<2x256xf32>, i32 -> vector<2x256xf32>
    %c7 = arith.constant 7 : index
    %c0_18 = arith.constant 0 : index
    %146 = vector.load %arg4[%c7, %c0_18] : memref<9x256xf32, #tpu.memory_space<vmem>>, vector<1x256xf32>
    %147 = vector.broadcast %146 : vector<1x256xf32> to vector<2x256xf32>
    %148 = arith.mulf %145, %147 : vector<2x256xf32>
    %c7_19 = arith.constant 7 : index
    %149 = memref.load %arg2[%c7_19] : memref<36xf32, #tpu.memory_space<smem>>
    %150 = vector.broadcast %149 : f32 to vector<2x256xf32>
    %151 = arith.mulf %150, %148 : vector<2x256xf32>
    %152 = arith.addf %132, %151 : vector<2x256xf32>
    %c16 = arith.constant 16 : index
    %153 = memref.load %arg2[%c16] : memref<36xf32, #tpu.memory_space<smem>>
    %154 = vector.broadcast %153 : f32 to vector<2x256xf32>
    %155 = arith.mulf %154, %148 : vector<2x256xf32>
    %156 = arith.addf %136, %155 : vector<2x256xf32>
    %c25 = arith.constant 25 : index
    %157 = memref.load %arg2[%c25] : memref<36xf32, #tpu.memory_space<smem>>
    %158 = vector.broadcast %157 : f32 to vector<2x256xf32>
    %159 = arith.mulf %158, %148 : vector<2x256xf32>
    %160 = arith.addf %140, %159 : vector<2x256xf32>
    %c34 = arith.constant 34 : index
    %161 = memref.load %arg2[%c34] : memref<36xf32, #tpu.memory_space<smem>>
    %162 = vector.broadcast %161 : f32 to vector<2x256xf32>
    %163 = arith.mulf %162, %148 : vector<2x256xf32>
    %164 = arith.addf %144, %163 : vector<2x256xf32>
    %c239_i32 = arith.constant 239 : i32
    %165 = tpu.dynamic_rotate %0 by %c239_i32 dim 1 : vector<2x256xf32>, i32 -> vector<2x256xf32>
    %c8 = arith.constant 8 : index
    %c0_20 = arith.constant 0 : index
    %166 = vector.load %arg4[%c8, %c0_20] : memref<9x256xf32, #tpu.memory_space<vmem>>, vector<1x256xf32>
    %167 = vector.broadcast %166 : vector<1x256xf32> to vector<2x256xf32>
    %168 = arith.mulf %165, %167 : vector<2x256xf32>
    %c8_21 = arith.constant 8 : index
    %169 = memref.load %arg2[%c8_21] : memref<36xf32, #tpu.memory_space<smem>>
    %170 = vector.broadcast %169 : f32 to vector<2x256xf32>
    %171 = arith.mulf %170, %168 : vector<2x256xf32>
    %172 = arith.addf %152, %171 : vector<2x256xf32>
    %c17 = arith.constant 17 : index
    %173 = memref.load %arg2[%c17] : memref<36xf32, #tpu.memory_space<smem>>
    %174 = vector.broadcast %173 : f32 to vector<2x256xf32>
    %175 = arith.mulf %174, %168 : vector<2x256xf32>
    %176 = arith.addf %156, %175 : vector<2x256xf32>
    %c26 = arith.constant 26 : index
    %177 = memref.load %arg2[%c26] : memref<36xf32, #tpu.memory_space<smem>>
    %178 = vector.broadcast %177 : f32 to vector<2x256xf32>
    %179 = arith.mulf %178, %168 : vector<2x256xf32>
    %180 = arith.addf %160, %179 : vector<2x256xf32>
    %c35 = arith.constant 35 : index
    %181 = memref.load %arg2[%c35] : memref<36xf32, #tpu.memory_space<smem>>
    %182 = vector.broadcast %181 : f32 to vector<2x256xf32>
    %183 = arith.mulf %182, %168 : vector<2x256xf32>
    %184 = arith.addf %164, %183 : vector<2x256xf32>
    %c0_22 = arith.constant 0 : index
    %c0_23 = arith.constant 0 : index
    %185 = vector.load %arg5[%c0_22, %c0_23] : memref<2x1024xf32, #tpu.memory_space<vmem>>, vector<2x256xf32>
    tpu.vector_store %arg5[%c0_22, %c0_23], %172 {strides = array<i32>} : memref<2x1024xf32, #tpu.memory_space<vmem>>, vector<2x256xf32>,
    %c0_24 = arith.constant 0 : index
    %c256 = arith.constant 256 : index
    %186 = vector.load %arg5[%c0_24, %c256] : memref<2x1024xf32, #tpu.memory_space<vmem>>, vector<2x256xf32>
    tpu.vector_store %arg5[%c0_24, %c256], %176 {strides = array<i32>} : memref<2x1024xf32, #tpu.memory_space<vmem>>, vector<2x256xf32>,
    %c0_25 = arith.constant 0 : index
    %c512 = arith.constant 512 : index
    %187 = vector.load %arg5[%c0_25, %c512] : memref<2x1024xf32, #tpu.memory_space<vmem>>, vector<2x256xf32>
    tpu.vector_store %arg5[%c0_25, %c512], %180 {strides = array<i32>} : memref<2x1024xf32, #tpu.memory_space<vmem>>, vector<2x256xf32>,
    %c0_26 = arith.constant 0 : index
    %c768 = arith.constant 768 : index
    %188 = vector.load %arg5[%c0_26, %c768] : memref<2x1024xf32, #tpu.memory_space<vmem>>, vector<2x256xf32>
    tpu.vector_store %arg5[%c0_26, %c768], %184 {strides = array<i32>} : memref<2x1024xf32, #tpu.memory_space<vmem>>, vector<2x256xf32>,
    return
  }
  func.func @transform_0(%arg0: i32) -> (i32, i32) {
    %c0_i32 = arith.constant 0 : i32
    %c0_i32_0 = arith.constant 0 : i32
    return %arg0, %c0_i32 : i32, i32
  }
  func.func @transform_1(%arg0: i32) -> i32 {
    %c0_i32 = arith.constant 0 : i32
    %c0_i32_0 = arith.constant 0 : i32
    return %c0_i32 : i32
  }
  func.func @transform_2(%arg0: i32) -> i32 {
    %c0_i32 = arith.constant 0 : i32
    %c0_i32_0 = arith.constant 0 : i32
    return %c0_i32 : i32
  }
  func.func @transform_3(%arg0: i32) -> (i32, i32) {
    %c0_i32 = arith.constant 0 : i32
    %c0_i32_0 = arith.constant 0 : i32
    %c0_i32_1 = arith.constant 0 : i32
    return %c0_i32, %c0_i32_0 : i32, i32
  }
  func.func @transform_4(%arg0: i32) -> (i32, i32) {
    %c0_i32 = arith.constant 0 : i32
    %c0_i32_0 = arith.constant 0 : i32
    return %arg0, %c0_i32 : i32, i32
  }
}

</mosaic_0001>

<bundles_post_ra>
// kernel: conv2d_pallas.1
= control target key start
LH: loop header
LB: loop body
LE: loop exit
PB: predicated region body
PF: predicated region fallthrough
CT: control target
= control target key end

     0   :  { %s1391_s0 = inlined_call_operand.vmem [shape: f32[2,256], index: 0, kind: input, shape index: {}]   ;;  %s1392_s1 = inlined_call_operand.vmem [shape: f32[36], index: 1, kind: input, shape index: {}]   ;;  %s1393_s2 = inlined_call_operand.vmem [shape: f32[4], index: 2, kind: input, shape index: {}]   ;;  %s1394_s3 = inlined_call_operand.vmem [shape: f32[9,256], index: 3, kind: input, shape index: {}]   ;;  %s1395_s4 = inlined_call_operand.vmem [shape: f32[2,1024], index: 4, kind: output, shape index: {}]  }
   0x1   :  { %1405 = sst [smem:[#allocation12_spill]] %s1395_s4 }
   0x2   :  { %9 = vsyncpa [#allocation3], 0  ;;  %s19_s17 = sshll.u32 %s1392_s1, 4  ;;  %s20_s17 = int_to_ptr.vmem [resolvable:$true] %s19_s17 }
   0x3   :  { %10 = vsyncpa [#allocation5], 0  ;;  %s29_s20 = sshll.u32 %s1393_s2, 4  ;;  %s833_s21 = scalar_lea.vmem %s20_s17, 16  ;;  %s30_s20 = int_to_ptr.vmem [resolvable:$true] %s29_s20 }
   0x4   :  { %p834_p0 = scmp.ne.s32.totalorder %s20_s17, %s833_s21  ;;  %p838_p1 = scmp.lt.s32.totalorder %s20_s17, %s20_s17 }
   0x5   :  { %p839_p2 = scmp.lt.s32.totalorder %s833_s21, %s833_s21 }
   0x7   :  { %p840_p3 = por %p839_p2, %p838_p1 }
   0x9   :  { %p841_p4 = pnand %p840_p3, %p834_p0 }
   0xb   :  { %844 = shalt.err (!%p841_p4)
}
   0xc   :  { %s861_s22 = smov [#allocation2]   ;;  %s845_s23 = scalar_lea.vmem %s30_s20, 16 }
   0xd   :  { %22 = dma.vmem_to_smem %s20_s17, 16, %s861_s22, [#allocation3]  }
   0xe   :  { %p846_p5 = scmp.ne.s32.totalorder %s30_s20, %s845_s23  ;;  %p850_p6 = scmp.lt.s32.totalorder %s30_s20, %s30_s20 }
   0xf   :  { %p851_p7 = scmp.lt.s32.totalorder %s845_s23, %s845_s23 }
  0x11   :  { %p852_p8 = por %p851_p7, %p850_p6 }
  0x13   :  { %p853_p9 = pnand %p852_p8, %p846_p5 }
  0x15   :  { %856 = shalt.err (!%p853_p9)
}
  0x16   :  { %s862_s1 = smov [#allocation4]  }
  0x17   :  { %32 = dma.vmem_to_smem %s30_s20, 16, %s862_s1, [#allocation5]  }
  0x18   :  { %857 = dma.done.wait [#allocation3], 16  }
  0x19   :  { %858 = vsyncadd [#allocation3], 4294967280 }
  0x1a   :  { %859 = dma.done.wait [#allocation5], 16  }
  0x1b   :  { %860 = vsyncadd [#allocation5], 4294967280 }
  0x1c   :  { %41 = sfence }
  0x1d   :  { %v71_v0 = vlaneseq  ;;  %v863_v1 = vmov 1983009808   ;;  %v906_v5 = vld [vmem:[%s1391_s0] sm:$0xf]  ;;  %s864_s25 = smov 16   ;;  %s865_s26 = smov 17  }
  0x1e   :  { %v69_v2 = vunpack.c.l.s4 %v863_v1  ;;  %s866_s27 = smov 15   ;;  %s867_s28 = smov 1   ;;  %v939_v9 = vld [vmem:[%s1394_s3 + $0x1] ss:$8 sm:$0x3] }
  0x1f   :  { %v72_v3 = vshrl.u32 %v71_v0, 7  ;;  %s868_s0 = smov 127   ;;  %s869_s29 = smov 113   ;;  %v944_v10 = vld [vmem:[%s1394_s3 + $0x2] ss:$8 sm:$0x3] }
  0x20   :  { %v70_v4 = vunpack.c.0.s8 %v69_v2  ;;  %s870_s30 = smov 112   ;;  %s871_s5 = smov 111   ;;  %v962_v13 = vand.u32 127, %v71_v0  ;;  %v984_v20 = vld [vmem:[%s1394_s3] ss:$8 sm:$0x3] }
  0x21   :  { %s912_s6 = sld [smem:[#allocation2 + $0x1]]  ;;  %s914_s7 = sld [smem:[#allocation2 + $0xa]]  ;;  %v950_v11 = vsub.s32 0, %v72_v3  ;;  %v952_v12 = vsub.s32 1, %v72_v3 }
  0x22   :  { %v908_v6 = vsub.s32 %v70_v4, %v72_v3  ;;  %s916_s8 = sld [smem:[#allocation2 + $0x13]]  ;;  %s918_s9 = sld [smem:[#allocation2 + $0x1c]]  ;;  %v998_v25 = vld [vmem:[%s1394_s3 + $0x3] ss:$8 sm:$0x3]  ;;  %vm169_vm0 = vcmp.lt.s32.totalorder %v962_v13, 16 }
  0x23   :  { %s920_s10 = sld [smem:[#allocation2 + $0x4]]  ;;  %s922_s11 = sld [smem:[#allocation2 + $0xd]]  ;;  %v178_v16 = vrot.slane %v939_v9, %v950_v11  ;;  %v182_v17 = vrot.slane %v939_v9, %v952_v12  ;;  %v264_v18 = vrot.slane %v944_v10, %v950_v11  ;;  %v268_v23 = vrot.slane %v944_v10, %v952_v12  ;;  %v1028_v38 = vld [vmem:[%s1394_s3 + $0x5] ss:$8 sm:$0x3] }
  0x24   :  { %v74_v7 = vrot.slane %v906_v5, %v908_v6  ;;  %s924_s12 = sld [smem:[#allocation2 + $0x2]]  ;;  %s926_s13 = sld [smem:[#allocation2 + $0x16]]  ;;  %v92_v41 = vrot.slane %v984_v20, %v950_v11  ;;  %v96_v42 = vrot.slane %v984_v20, %v952_v12  ;;  %v350_v45 = vrot.slane %v998_v25, %v950_v11  ;;  %v1076_v57 = vld [vmem:[%s1394_s3 + $0x6] ss:$8 sm:$0x3] }
  0x25   :  { %s928_s14 = sld [smem:[#allocation2 + $0xb]]  ;;  %s930_s15 = sld [smem:[#allocation2 + $0x1f]]  ;;  %v354_v46 = vrot.slane %v998_v25, %v952_v12  ;;  %vm255_vm1 = vcmp.lt.s32.totalorder %v962_v13, 15  ;;  %vm84_vm2 = vcmp.lt.s32.totalorder %v962_v13, 17  ;;  %v436_v60 = vrot.slane %v1028_v38, %v950_v11 }
  0x26   :  { %165 = vrot.lane.b32.xlu1 %v74_v7, %s864_s25  ;;  %78 = vrot.lane.b32.xlu0 %v74_v7, %s865_s26  ;;  %v75_v8 = vcombine.high %v74_v7, %v74_v7  ;;  %s932_s16 = sld [smem:[#allocation2 + $0x14]]  ;;  %s934_s17 = sld [smem:[#allocation2 + $0x1d]]  ;;  %v440_v61 = vrot.slane %v1028_v38, %v952_v12  ;;  %v1088_v62 = vld [vmem:[%s1394_s3 + $0x7] ss:$8 sm:$0x3]  ;;  %v522_v3 = vrot.slane %v1076_v57, %v950_v11  ;;  %vm341_vm3 = vcmp.lt.s32.totalorder %v962_v13, 1 }
  0x27   :  { %s946_s22 = sld [smem:[#allocation4]]  ;;  %s948_s23 = sld [smem:[#allocation4 + $0x1]]  ;;  %v188_v21 = vstv %s912_s6  ;;  %v204_v22 = vstv %s914_s7  ;;  %v526_v4 = vrot.slane %v1076_v57, %v952_v12  ;;  %vm427_vm4 = vcmp.lt.s32.totalorder %v962_v13, 127 }
  0x28   :  { %s954_s1 = sld [smem:[#allocation4 + $0x2]]  ;;  %s956_s2 = sld [smem:[#allocation4 + $0x3]]  ;;  %v220_v26 = vstv %s916_s8  ;;  %v236_v27 = vstv %s918_s9  ;;  %vm513_vm5 = vcmp.lt.s32.totalorder %v962_v13, 113  ;;  %vm599_vm6 = vcmp.lt.s32.totalorder %v962_v13, 112 }
  0x29   :  { %s958_s24 = sld [smem:[#allocation2]]  ;;  %v44_v14 = vstv %s920_s10  ;;  %v50_v15 = vstv %s922_s11  ;;  %s988_s10 = sld [smem:[#allocation2 + $0x1e]]  ;;  %vm685_vm7 = vcmp.lt.s32.totalorder %v962_v13, 111 }
  0x2a   :  { %251 = vrot.lane.b32.xlu0 %v74_v7, %s866_s27  ;;  %167 = vrot.lane.b32.xlu1 %v75_v8, %s864_s25  ;;  %s960_s25 = sld [smem:[#allocation2 + $0x9]]  ;;  %v56_v19 = vstv %s926_s13  ;;  %s1000_s18 = sld [smem:[#allocation2 + $0x5]]  ;;  %v45_v28 = vmul.f32 %v44_v14, %v906_v5  ;;  %v51_v29 = vmul.f32 %v50_v15, %v906_v5  ;;  %v274_v30 = vstv %s924_s12 }
  0x2b   :  { %v62_v24 = vstv %s930_s15  ;;  %s1002_s19 = sld [smem:[#allocation2 + $0xe]]  ;;  %s1009_s15 = sld [smem:[#allocation2 + $0x17]]  ;;  %v57_v33 = vmul.f32 %v56_v19, %v906_v5  ;;  %v290_v34 = vstv %s928_s14 }
  0x2c   :  { %s1011_s20 = sld [smem:[#allocation2 + $0x20]]  ;;  %s1017_s21 = sld [smem:[#allocation2 + $0x6]]  ;;  %v306_v35 = vstv %s932_s16  ;;  %v63_v37 = vmul.f32 %v62_v24, %v906_v5  ;;  %v322_v39 = vstv %s934_s17 }
  0x2d   :  { %v47_v31 = vstv %s946_s22  ;;  %v53_v32 = vstv %s948_s23  ;;  %s1030_s13 = sld [smem:[#allocation2 + $0x18]]  ;;  %s1032_s22 = sld [smem:[#allocation2 + $0x21]] }
  0x2e   :  { %253 = vrot.lane.b32.xlu1 %v75_v8, %s866_s27  ;;  %80 = vrot.lane.b32.xlu0 %v75_v8, %s865_s26  ;;  %s964_s26 = sld [smem:[#allocation2 + $0x12]]  ;;  %s966_s27 = sld [smem:[#allocation2 + $0x1b]]  ;;  %v59_v36 = vstv %s954_s1  ;;  %v65_v40 = vstv %s956_s2  ;;  %v1044_v43 = vadd.f32 %v47_v31, %v45_v28  ;;  %v1046_v44 = vadd.f32 %v53_v32, %v51_v29 }
  0x2f   :  { %s1040_s23 = sld [smem:[#allocation2 + $0x7]]  ;;  %s1042_s1 = sld [smem:[#allocation2 + $0x10]]  ;;  %v102_v47 = vstv %s958_s24  ;;  %v1060_v50 = vadd.f32 %v59_v36, %v57_v33  ;;  %v1069_v54 = vadd.f32 %v65_v40, %v63_v37  ;;  %v408_v59 = vstv %s988_s10  ;;  %v1109_v29 = vld [vmem:[%s1394_s3 + $0x10] ss:$8 sm:$0x3] }
  0x30   :  { %1406 = sst [smem:[#allocation8_spill]] %s960_s25  ;;  %s1052_s2 = sld [smem:[#allocation2 + $0x19]]  ;;  %v118_v48 = vstv %s960_s25  ;;  %v446_v63 = vstv %s1000_s18 }
  0x31   :  { %s1062_s11 = sld [smem:[#allocation2 + $0x8]]  ;;  %s1064_s4 = sld [smem:[#allocation2 + $0x11]]  ;;  %v462_v0 = vstv %s1002_s19  ;;  %v478_v1 = vstv %s1009_s15 }
  0x32   :  { %339 = vrot.lane.b32.xlu1 %v75_v8, %s867_s28  ;;  %337 = vrot.lane.b32.xlu0 %v74_v7, %s867_s28  ;;  %s970_s28 = sld [smem:[#allocation2 + $0x3]]  ;;  %v494_v2 = vstv %s1011_s20  ;;  %v532_v5 = vstv %s1017_s21  ;;  %s1321_s9 = sld [smem:[#allocation2 + $0x1a]] }
  0x33   :  { %s1323_s12 = sld [smem:[#allocation2 + $0x23]]  ;;  %s1434_s16 = sld [smem:[#allocation12_spill]] }
  0x34   :  { %1407 = sst [smem:[#allocation9_spill]] %s964_s26  ;;  %v134_v49 = vstv %s964_s26  ;;  %v150_v53 = vstv %s966_s27 }
  0x35   :  { %1408 = sst [smem:[#allocation10_spill]] %s966_s27 }
  0x36   :  { %425 = vrot.lane.b32.xlu1 %v75_v8, %s868_s0  ;;  %423 = vrot.lane.b32.xlu0 %v74_v7, %s868_s0  ;;  %s972_s0 = sld [smem:[#allocation2 + $0xc]] }
  0x38   :  { %1409 = sst [smem:[#allocation11_spill]] %s970_s28  ;;  %v360_v55 = vstv %s970_s28 }
  0x3a   :  { %511 = vrot.lane.b32.xlu1 %v75_v8, %s869_s29  ;;  %509 = vrot.lane.b32.xlu0 %v74_v7, %s869_s29  ;;  %s1019_s29 = sld [smem:[#allocation2 + $0xf]] }
  0x3c   :  { %v376_v56 = vstv %s972_s0 }
  0x3e   :  { %597 = vrot.lane.b32.xlu1 %v75_v8, %s870_s30  ;;  %595 = vrot.lane.b32.xlu0 %v74_v7, %s870_s30  ;;  %s1054_s30 = sld [smem:[#allocation2 + $0x22]] }
  0x42   :  { %683 = vrot.lane.b32.xlu1 %v75_v8, %s871_s5  ;;  %681 = vrot.lane.b32.xlu0 %v74_v7, %s871_s5  ;;  %s986_s5 = sld [smem:[#allocation2 + $0x15]]  ;;  %v548_v7 = vstv %s1019_s29 }
  0x48   :  { %v392_v58 = vstv %s986_s5 }
  0x98   :  { %v166_v51 = vpop.permute.xlu1 %165  ;;  %v1066_v52 = vpop.permute.xlu0 %78 }
  0x9c   :  { %v252_v8 = vpop.permute.xlu0 %251  ;;  %v168_v14 = vpop.permute.xlu1 %167 }
  0x9d   :  { %v170_v31 = vsel %vm169_vm0, %v166_v51, %v168_v14  ;;  %v171_v32 = vsel %vm169_vm0, %v168_v14, %v166_v51 }
  0x9e   :  { %v185_v37 = vmul.f32 %v178_v16, %v171_v32  ;;  %v186_v40 = vmul.f32 %v182_v17, %v170_v31 }
  0xa0   :  { %v189_v19 = vmul.f32 %v188_v21, %v185_v37  ;;  %v190_v16 = vmul.f32 %v188_v21, %v186_v40  ;;  %v205_v32 = vmul.f32 %v204_v22, %v185_v37  ;;  %v206_v9 = vmul.f32 %v204_v22, %v186_v40  ;;  %v254_v17 = vpop.permute.xlu1 %253  ;;  %v81_v31 = vpop.permute.xlu0 %80 }
  0xa1   :  { %v221_v24 = vmul.f32 %v220_v26, %v185_v37  ;;  %v222_v28 = vmul.f32 %v220_v26, %v186_v40  ;;  %v237_v51 = vmul.f32 %v236_v27, %v185_v37  ;;  %v238_v14 = vmul.f32 %v236_v27, %v186_v40 }
  0xa2   :  { %v193_v36 = vcombine.low %v189_v19, %v190_v16  ;;  %v209_v33 = vcombine.low %v205_v32, %v206_v9  ;;  %v256_v21 = vsel %vm255_vm1, %v252_v8, %v254_v17  ;;  %v257_v22 = vsel %vm255_vm1, %v254_v17, %v252_v8 }
  0xa3   :  { %v225_v15 = vcombine.low %v221_v24, %v222_v28  ;;  %v241_v26 = vcombine.low %v237_v51, %v238_v14  ;;  %v271_v27 = vmul.f32 %v264_v18, %v257_v22  ;;  %v272_v19 = vmul.f32 %v268_v23, %v256_v21 }
  0xa4   :  { %v1160_v37 = vrot.slane %v193_v36, %v908_v6  ;;  %v1163_v8 = vrot.slane %v209_v33, %v908_v6  ;;  %v85_v24 = vsel %vm84_vm2, %v1066_v52, %v81_v31  ;;  %v86_v18 = vsel %vm84_vm2, %v81_v31, %v1066_v52  ;;  %v340_v28 = vpop.permute.xlu1 %339  ;;  %v338_v40 = vpop.permute.xlu0 %337 }
  0xa5   :  { %v232_v10 = vrot.slane %v225_v15, %v908_v6  ;;  %v1173_v23 = vrot.slane %v241_v26, %v908_v6  ;;  %v275_v36 = vmul.f32 %v274_v30, %v271_v27  ;;  %v276_v33 = vmul.f32 %v274_v30, %v272_v19 }
  0xa6   :  { %v291_v51 = vmul.f32 %v290_v34, %v271_v27  ;;  %v292_v14 = vmul.f32 %v290_v34, %v272_v19  ;;  %v307_v16 = vmul.f32 %v306_v35, %v271_v27  ;;  %v308_v52 = vmul.f32 %v306_v35, %v272_v19 }
  0xa7   :  { %v279_v15 = vcombine.low %v275_v36, %v276_v33  ;;  %v323_v32 = vmul.f32 %v322_v39, %v271_v27  ;;  %v324_v9 = vmul.f32 %v322_v39, %v272_v19  ;;  %v99_v30 = vmul.f32 %v92_v41, %v86_v18 }
  0xa8   :  { %v295_v17 = vcombine.low %v291_v51, %v292_v14  ;;  %v311_v31 = vcombine.low %v307_v16, %v308_v52  ;;  %v100_v34 = vmul.f32 %v96_v42, %v85_v24  ;;  %v342_v35 = vsel %vm341_vm3, %v338_v40, %v340_v28  ;;  %v426_v42 = vpop.permute.xlu1 %425  ;;  %v424_v24 = vpop.permute.xlu0 %423 }
  0xa9   :  { %v286_v21 = vrot.slane %v279_v15, %v908_v6  ;;  %v327_v39 = vcombine.low %v323_v32, %v324_v9  ;;  %v103_v22 = vmul.f32 %v102_v47, %v99_v30  ;;  %v119_v41 = vmul.f32 %v118_v48, %v99_v30 }
  0xaa   :  { %v302_v26 = vrot.slane %v295_v17, %v908_v6  ;;  %v318_v27 = vrot.slane %v311_v31, %v908_v6  ;;  %v104_v19 = vmul.f32 %v102_v47, %v100_v34  ;;  %v120_v20 = vmul.f32 %v118_v48, %v100_v34 }
  0xab   :  { %v334_v18 = vrot.slane %v327_v39, %v908_v6  ;;  %v135_v36 = vmul.f32 %v134_v49, %v99_v30  ;;  %v136_v33 = vmul.f32 %v134_v49, %v100_v34  ;;  %v151_v51 = vmul.f32 %v150_v53, %v99_v30 }
  0xac   :  { %v107_v14 = vcombine.low %v103_v22, %v104_v19  ;;  %v123_v16 = vcombine.low %v119_v41, %v120_v20  ;;  %v152_v52 = vmul.f32 %v150_v53, %v100_v34  ;;  %v343_v47 = vsel %vm341_vm3, %v340_v28, %v338_v40 }
  0xad   :  { %v139_v48 = vcombine.low %v135_v36, %v136_v33  ;;  %v357_v15 = vmul.f32 %v350_v45, %v343_v47  ;;  %v358_v49 = vmul.f32 %v354_v46, %v342_v35  ;;  %v428_v32 = vsel %vm427_vm4, %v424_v24, %v426_v42  ;;  %v512_v36 = vpop.permute.xlu1 %511  ;;  %v510_v33 = vpop.permute.xlu0 %509 }
  0xae   :  { %v114_v9 = vrot.slane %v107_v14, %v908_v6  ;;  %v130_v53 = vrot.slane %v123_v16, %v908_v6  ;;  %v155_v28 = vcombine.low %v151_v51, %v152_v52  ;;  %v429_v40 = vsel %vm427_vm4, %v426_v42, %v424_v24 }
  0xaf   :  { %v146_v45 = vrot.slane %v139_v48, %v908_v6  ;;  %v361_v25 = vmul.f32 %v360_v55, %v357_v15  ;;  %v362_v46 = vmul.f32 %v360_v55, %v358_v49  ;;  %v377_v30 = vmul.f32 %v376_v56, %v357_v15 }
  0xb0   :  { %v116_v17 = vadd.f32 %v114_v9, %v1044_v43  ;;  %v132_v31 = vadd.f32 %v130_v53, %v1046_v44  ;;  %v162_v34 = vrot.slane %v155_v28, %v908_v6  ;;  %v378_v35 = vmul.f32 %v376_v56, %v358_v49 }
  0xb1   :  { %v148_v39 = vadd.f32 %v146_v45, %v1060_v50  ;;  %v365_v22 = vcombine.low %v361_v25, %v362_v46  ;;  %v393_v41 = vmul.f32 %v392_v58, %v357_v15  ;;  %v394_v19 = vmul.f32 %v392_v58, %v358_v49  ;;  %v598_v53 = vpop.permute.xlu1 %597  ;;  %v596_v28 = vpop.permute.xlu0 %595 }
  0xb2   :  { %v164_v55 = vadd.f32 %v162_v34, %v1069_v54  ;;  %v202_v43 = vadd.f32 %v1160_v37, %v116_v17  ;;  %v218_v44 = vadd.f32 %v1163_v8, %v132_v31  ;;  %v381_v20 = vcombine.low %v377_v30, %v378_v35 }
  0xb3   :  { %v234_v42 = vadd.f32 %v232_v10, %v148_v39  ;;  %v372_v56 = vrot.slane %v365_v22, %v908_v6  ;;  %v397_v24 = vcombine.low %v393_v41, %v394_v19  ;;  %v409_v50 = vmul.f32 %v408_v59, %v357_v15 }
  0xb4   :  { %v250_v58 = vadd.f32 %v1173_v23, %v164_v55  ;;  %v288_v51 = vadd.f32 %v286_v21, %v202_v43  ;;  %v304_v54 = vadd.f32 %v302_v26, %v218_v44  ;;  %v388_v37 = vrot.slane %v381_v20, %v908_v6 }
  0xb5   :  { %v320_v8 = vadd.f32 %v318_v27, %v234_v42  ;;  %v404_v10 = vrot.slane %v397_v24, %v908_v6  ;;  %v410_v14 = vmul.f32 %v408_v59, %v358_v49  ;;  %v443_v16 = vmul.f32 %v436_v60, %v428_v32  ;;  %v684_v24 = vpop.permute.xlu1 %683 }
  0xb6   :  { %v336_v23 = vadd.f32 %v334_v18, %v250_v58  ;;  %v374_v21 = vadd.f32 %v372_v56, %v288_v51  ;;  %v390_v52 = vadd.f32 %v388_v37, %v304_v54  ;;  %v444_v26 = vmul.f32 %v440_v61, %v429_v40 }
  0xb7   :  { %v406_v47 = vadd.f32 %v404_v10, %v320_v8  ;;  %v413_v27 = vcombine.low %v409_v50, %v410_v14  ;;  %v447_v48 = vmul.f32 %v446_v63, %v443_v16  ;;  %v463_v15 = vmul.f32 %v462_v0, %v443_v16  ;;  %v682_v50 = vpop.permute.xlu0 %681 }
  0xb8   :  { %v448_v59 = vmul.f32 %v446_v63, %v444_v26  ;;  %v464_v60 = vmul.f32 %v462_v0, %v444_v26  ;;  %v479_v18 = vmul.f32 %v478_v1, %v443_v16  ;;  %v480_v49 = vmul.f32 %v478_v1, %v444_v26 }
  0xb9   :  { %v420_v32 = vrot.slane %v413_v27, %v908_v6  ;;  %v495_v38 = vmul.f32 %v494_v2, %v443_v16  ;;  %v496_v61 = vmul.f32 %v494_v2, %v444_v26  ;;  %v514_v9 = vsel %vm513_vm5, %v510_v33, %v512_v36 }
  0xba   :  { %v451_v63 = vcombine.low %v447_v48, %v448_v59  ;;  %v467_v0 = vcombine.low %v463_v15, %v464_v60  ;;  %v483_v40 = vcombine.low %v479_v18, %v480_v49  ;;  %v515_v1 = vsel %vm513_vm5, %v512_v36, %v510_v33 }
  0xbb   :  { %v422_v45 = vadd.f32 %v420_v32, %v336_v23  ;;  %v499_v25 = vcombine.low %v495_v38, %v496_v61  ;;  %v529_v2 = vmul.f32 %v522_v3, %v514_v9  ;;  %v530_v46 = vmul.f32 %v526_v4, %v515_v1 }
  0xbc   :  { %v458_v30 = vrot.slane %v451_v63, %v908_v6  ;;  %v474_v17 = vrot.slane %v467_v0, %v908_v6  ;;  %v490_v31 = vrot.slane %v483_v40, %v908_v6  ;;  %v600_v34 = vsel %vm599_vm6, %v596_v28, %v598_v53 }
  0xbd   :  { %v506_v35 = vrot.slane %v499_v25, %v908_v6  ;;  %v533_v3 = vmul.f32 %v532_v5, %v529_v2  ;;  %v534_v57 = vmul.f32 %v532_v5, %v530_v46  ;;  %v549_v4 = vmul.f32 %v548_v7, %v529_v2 }
  0xbe   :  { %v460_v39 = vadd.f32 %v458_v30, %v374_v21  ;;  %v476_v22 = vadd.f32 %v474_v17, %v390_v52  ;;  %v492_v41 = vadd.f32 %v490_v31, %v406_v47  ;;  %v550_v19 = vmul.f32 %v548_v7, %v530_v46 }
  0xbf   :  { %v508_v55 = vadd.f32 %v506_v35, %v422_v45  ;;  %v537_v43 = vcombine.low %v533_v3, %v534_v57  ;;  %v1414_v44 = vstv %s1030_s13  ;;  %v1416_v33 = vstv %s1032_s22 }
  0xc0   :  { %v565_v20 = vmul.f32 %v1414_v44, %v529_v2  ;;  %v1415_v42 = vmov %v1414_v44  ;;  %v553_v36 = vcombine.low %v549_v4, %v550_v19  ;;  %v581_v58 = vmul.f32 %v1416_v33, %v529_v2 }
  0xc1   :  { %v566_v56 = vmul.f32 %v1415_v42, %v530_v46  ;;  %v1417_v5 = vmov %v1416_v33  ;;  %v601_v54 = vsel %vm599_vm6, %v598_v53, %v596_v28  ;;  %v544_v7 = vrot.slane %v537_v43, %v908_v6 }
  0xc2   :  { %v582_v51 = vmul.f32 %v1417_v5, %v530_v46  ;;  %v1418_v8 = vrot.slane %v1088_v62, %v950_v11  ;;  %v1419_v14 = vrot.slane %v1088_v62, %v952_v12  ;;  %v560_v23 = vrot.slane %v553_v36, %v908_v6 }
  0xc3   :  { %v569_v37 = vcombine.low %v565_v20, %v566_v56  ;;  %v686_v52 = vsel %vm685_vm7, %v682_v50, %v684_v24  ;;  %v687_v26 = vsel %vm685_vm7, %v684_v24, %v682_v50  ;;  %v546_v47 = vadd.f32 %v544_v7, %v460_v39 }
  0xc4   :  { %v615_v10 = vmul.f32 %v1418_v8, %v600_v34  ;;  %v616_v16 = vmul.f32 %v1419_v14, %v601_v54  ;;  %v585_v21 = vcombine.low %v581_v58, %v582_v51  ;;  %v1420_v48 = vstv %s1040_s23 }
  0xc5   :  { %v576_v27 = vrot.slane %v569_v37, %v908_v6  ;;  %v1421_v62 = vmov %v1420_v48  ;;  %v562_v60 = vadd.f32 %v560_v23, %v476_v22  ;;  %v1422_v49 = vstv %s1042_s1 }
  0xc6   :  { %v619_v15 = vmul.f32 %v1420_v48, %v615_v10  ;;  %v620_v59 = vmul.f32 %v1421_v62, %v616_v16  ;;  %v592_v18 = vrot.slane %v585_v21, %v908_v6  ;;  %v635_v32 = vmul.f32 %v1422_v49, %v615_v10 }
  0xc7   :  { %v1423_v38 = vmov %v1422_v49  ;;  %v578_v13 = vadd.f32 %v576_v27, %v492_v41  ;;  %v1424_v53 = vstv %s1052_s2  ;;  %v1426_v45 = vstv %s1054_s30 }
  0xc8   :  { %v636_v61 = vmul.f32 %v1423_v38, %v616_v16  ;;  %v623_v9 = vcombine.low %v619_v15, %v620_v59  ;;  %v651_v28 = vmul.f32 %v1424_v53, %v615_v10  ;;  %v1425_v63 = vmov %v1424_v53 }
  0xc9   :  { %v652_v0 = vmul.f32 %v1425_v63, %v616_v16  ;;  %v594_v40 = vadd.f32 %v592_v18, %v508_v55  ;;  %v667_v25 = vmul.f32 %v1426_v45, %v615_v10  ;;  %v1427_v2 = vmov %v1426_v45 }
  0xca   :  { %v639_v1 = vcombine.low %v635_v32, %v636_v61  ;;  %v668_v46 = vmul.f32 %v1427_v2, %v616_v16  ;;  %v630_v30 = vrot.slane %v623_v9, %v908_v6  ;;  %v1428_v31 = vrot.slane %v1109_v29, %v950_v11 }
  0xcb   :  { %v655_v17 = vcombine.low %v651_v28, %v652_v0  ;;  %v1429_v35 = vrot.slane %v1109_v29, %v952_v12  ;;  %v736_v39 = vstv %s1321_s9  ;;  %v752_v22 = vstv %s1323_s12 }
  0xcc   :  { %v701_v34 = vmul.f32 %v1428_v31, %v686_v52  ;;  %v646_v57 = vrot.slane %v639_v1, %v908_v6  ;;  %v671_v4 = vcombine.low %v667_v25, %v668_v46  ;;  %v632_v41 = vadd.f32 %v630_v30, %v546_v47 }
  0xcd   :  { %v702_v3 = vmul.f32 %v1429_v35, %v687_v26  ;;  %v662_v19 = vrot.slane %v655_v17, %v908_v6  ;;  %v1430_v55 = vstv %s1062_s11  ;;  %v1432_v56 = vstv %s1064_s4 }
  0xce   :  { %v705_v43 = vmul.f32 %v1430_v55, %v701_v34  ;;  %v1431_v44 = vmov %v1430_v55  ;;  %v648_v42 = vadd.f32 %v646_v57, %v562_v60  ;;  %v678_v11 = vrot.slane %v671_v4, %v908_v6 }
  0xcf   :  { %v706_v20 = vmul.f32 %v1431_v44, %v702_v3  ;;  %v721_v24 = vmul.f32 %v1432_v56, %v701_v34  ;;  %v1433_v50 = vmov %v1432_v56  ;;  %v664_v29 = vadd.f32 %v662_v19, %v578_v13 }
  0xd0   :  { %v722_v12 = vmul.f32 %v1433_v50, %v702_v3  ;;  %v737_v33 = vmul.f32 %v736_v39, %v701_v34  ;;  %v738_v58 = vmul.f32 %v736_v39, %v702_v3  ;;  %v680_v5 = vadd.f32 %v678_v11, %v594_v40 }
  0xd1   :  { %v709_v36 = vcombine.low %v705_v43, %v706_v20  ;;  %v753_v54 = vmul.f32 %v752_v22, %v701_v34  ;;  %v754_v7 = vmul.f32 %v752_v22, %v702_v3 }
  0xd2   :  { %v725_v51 = vcombine.low %v721_v24, %v722_v12  ;;  %v741_v8 = vcombine.low %v737_v33, %v738_v58 }
  0xd3   :  { %v716_v37 = vrot.slane %v709_v36, %v908_v6  ;;  %v757_v14 = vcombine.low %v753_v54, %v754_v7 }
  0xd4   :  { %v732_v10 = vrot.slane %v725_v51, %v908_v6  ;;  %v748_v23 = vrot.slane %v741_v8, %v908_v6 }
  0xd5   :  { %v718_v16 = vadd.f32 %v716_v37, %v632_v41  ;;  %v764_v52 = vrot.slane %v757_v14, %v908_v6 }
  0xd6   :  { %v734_v21 = vadd.f32 %v732_v10, %v648_v42  ;;  %v750_v26 = vadd.f32 %v748_v23, %v664_v29 }
  0xd7   :  { %767 = vst [vmem:[%s1434_s16] sm:$0xf] %v718_v16  ;;  %v766_v47 = vadd.f32 %v764_v52, %v680_v5 }
  0xd8   :  { %768 = vst [vmem:[%s1434_s16 + $0x4] sm:$0xf] %v734_v21  ;;  %769 = vst [vmem:[%s1434_s16 + $0x8] sm:$0xf] %v750_v26 }
  0xd9   :  { %770 = vst [vmem:[%s1434_s16 + $0xc] sm:$0xf] %v766_v47 }
  0xda   :  { %775 = vsyncpa [#allocation3], 1 }
  0xdb   :  { %776 = vsyncpa [#allocation5], 1 }

</bundles_post_ra>
